<compile_context>
chip_gen: v7x
topology: tpu7x:2x2x1
jax: 0.10.0
libtpu: 0.0.40
codegen_flags: <defaults>
</compile_context>

<pallas_src>
import jax
import jax.numpy as jnp
from jax.experimental import pallas as pl
from jax.experimental.pallas import tpu as pltpu


def _make_mlp_kernel(in_dim, tanh_dtype):
    """Build the fused 4-layer tanh-MLP kernel (batch on the lane axis).

    Ref layouts inside the kernel:
      x_ref  : [in_dim, tile_n]   lane-dense batch tile
      wK_ref : [out_feat, in_feat]
      bK_ref : [out_feat, 1]      (broadcast along lanes)
      o_ref  : [out_dim, tile_n]  lane-dense unmasked stores
    """

    def kernel(x_ref,
               w1_ref, b1_ref,
               w2_ref, b2_ref,
               w3_ref, b3_ref,
               w4_ref, b4_ref,
               o_ref):
        xt = x_ref[...]                       # [in_dim, T] f32
        w1 = w1_ref[...]                      # [H, in_dim]

        # --- Layer 1: K=in_dim (tiny) -> rank-1 FMAs on the VPU, not the MXU.
        z = w1[:, 0:1] * xt[0:1, :]           # [H,1]*[1,T] -> [H,T]
        for k in range(1, in_dim):            # static Python loop (in_dim small)
            z = z + w1[:, k:k + 1] * xt[k:k + 1, :]
        z = z + b1_ref[...]
        h = jnp.tanh(z.astype(tanh_dtype)).astype(jnp.float32)

        # --- Layers 2 & 3: 32x32 matmuls stay on the MXU, f32 accumulation.
        h = jnp.dot(w2_ref[...], h, preferred_element_type=jnp.float32) + b2_ref[...]
        h = jnp.tanh(h.astype(tanh_dtype)).astype(jnp.float32)
        h = jnp.dot(w3_ref[...], h, preferred_element_type=jnp.float32) + b3_ref[...]
        h = jnp.tanh(h.astype(tanh_dtype)).astype(jnp.float32)

        # --- Output layer (no activation).
        out = jnp.dot(w4_ref[...], h, preferred_element_type=jnp.float32) + b4_ref[...]
        o_ref[...] = out.astype(o_ref.dtype)

    return kernel


def _choose_tile(n, desired):
    """Lane-dense batch tile: multiple of 128, never larger than needed for N."""
    t = max(128, (desired // 128) * 128)
    n_up = max(128, ((n + 127) // 128) * 128)   # smallest 128-multiple covering N
    return min(t, n_up)


def pinns_forward(x, params, *, tile_n=8192, tanh_dtype=jnp.float32,
                  vmem_limit_bytes=None):
    """PINNs.forward(x) == basic_net(x), computed in a single Pallas kernel.

    x: [N, in_dim] float32 (any N; padded internally to a tile multiple).
    params: (w1, b1, w2, b2, w3, b3, w4, b4) in torch Linear layout
            (wK: [out_feat, in_feat], bK: [out_feat, 1]).
    tile_n: batch tile (lane axis).  8192 fits default scoped VMEM on all
            generations; pass vmem_limit_bytes if you sweep it to 16K-32K.
    """
    (w1, b1, w2, b2, w3, b3, w4, b4) = params
    n, in_dim = x.shape
    hidden = w1.shape[0]
    out_dim = w4.shape[0]

    tile_n = _choose_tile(n, tile_n)
    n_pad = pl.cdiv(n, tile_n) * tile_n

    # Batch on the lane axis: [in_dim, N]; pad batch up to a tile multiple.
    xt = x.T
    if n_pad != n:
        xt = jnp.pad(xt, ((0, 0), (0, n_pad - n)))

    # Tiny weights/biases stay resident as full-array blocks (constant index
    # map -> never re-DMA'd).  NOTE: pipeline_mode=pl.Buffered(1) would also
    # drop their double buffers; skipped as pure hygiene (VMEM is not tight).
    def full_spec(arr):
        return pl.BlockSpec(arr.shape, lambda i: (0, 0))

    grid = (n_pad // tile_n,)

    # Advisory cost for XLA's scheduler.
    flops = 2 * (in_dim * hidden + 2 * hidden * hidden + hidden * out_dim) * n_pad
    transcendentals = 3 * hidden * n_pad
    bytes_accessed = 4 * (in_dim + out_dim) * n_pad + sum(4 * a.size for a in params)

    y_t = pl.pallas_call(
        _make_mlp_kernel(in_dim, tanh_dtype),
        out_shape=jax.ShapeDtypeStruct((out_dim, n_pad), x.dtype),
        grid_spec=pltpu.PrefetchScalarGridSpec(
            num_scalar_prefetch=0,
            grid=grid,
            in_specs=[
                pl.BlockSpec((in_dim, tile_n), lambda i: (0, i)),
                full_spec(w1), full_spec(b1),
                full_spec(w2), full_spec(b2),
                full_spec(w3), full_spec(b3),
                full_spec(w4), full_spec(b4),
            ],
            out_specs=pl.BlockSpec((out_dim, tile_n), lambda i: (0, i)),
        ),
        compiler_params=pltpu.CompilerParams(
            dimension_semantics=("parallel",),
            vmem_limit_bytes=vmem_limit_bytes),
        cost_estimate=pl.CostEstimate(
            flops=flops,
            transcendentals=transcendentals,
            bytes_accessed=bytes_accessed),
    )(xt, w1, b1, w2, b2, w3, b3, w4, b4)

    # Drop batch padding.  For out_dim==1, [1, n] -> [n, 1] is a free reshape
    # (identical row-major layout); otherwise transpose.
    y = y_t[:, :n]
    if out_dim == 1:
        return y.reshape(n, 1)
    return y.T


def init_basic_net_params(key, in_dim=2, hidden=32, out_dim=1):
    """Deterministic Xavier-style init; torch nn.Linear layout."""
    dims = [in_dim, hidden, hidden, hidden, out_dim]
    params = []
    for i in range(4):
        key, kw, kb = jax.random.split(key, 3)
        fan_in, fan_out = dims[i], dims[i + 1]
        scale = jnp.sqrt(6.0 / (fan_in + fan_out))
        w = jax.random.uniform(kw, (fan_out, fan_in), jnp.float32,
                               minval=-scale, maxval=scale)
        b = jax.random.uniform(kb, (fan_out, 1), jnp.float32,
                               minval=-scale, maxval=scale)
        params.extend([w, b])
    return tuple(params)


def reference_forward(x, params):
    (w1, b1, w2, b2, w3, b3, w4, b4) = params
    h = jnp.tanh(x @ w1.T + b1.T)
    h = jnp.tanh(h @ w2.T + b2.T)
    h = jnp.tanh(h @ w3.T + b3.T)
    return h @ w4.T + b4.T


if __name__ == "__main__":
    key = jax.random.PRNGKey(0)
    k_params, k_x = jax.random.split(key)

    in_dim, hidden, out_dim = 2, 32, 1
    batch = 300  # collocation points (deliberately not a tile multiple)

    params = init_basic_net_params(k_params, in_dim, hidden, out_dim)
    x = jax.random.uniform(k_x, (batch, in_dim), jnp.float32,
                           minval=-1.0, maxval=1.0)

    y = pinns_forward(x, params)
    y = jax.block_until_ready(y)

    y_ref = reference_forward(x, params)
    assert y.shape == (batch, out_dim)
    assert jnp.allclose(y, y_ref, atol=1e-5, rtol=1e-5)

    # TODO(synk): PINNs.pde()/output_transform() are question-specific stubs in
    # the reference module (return 0 / pass); nothing to lower.
    print("KERNEL_OK")
</pallas_src>

<mosaic_0001>
module attributes {stable_mosaic.version = 11 : i64} {
  func.func @kernel(%arg0: i32, %arg1: memref<2x384xf32, #tpu.memory_space<vmem>>, %arg2: memref<32x2xf32, #tpu.memory_space<vmem>>, %arg3: memref<32x1xf32, #tpu.memory_space<vmem>>, %arg4: memref<32x32xf32, #tpu.memory_space<vmem>>, %arg5: memref<32x1xf32, #tpu.memory_space<vmem>>, %arg6: memref<32x32xf32, #tpu.memory_space<vmem>>, %arg7: memref<32x1xf32, #tpu.memory_space<vmem>>, %arg8: memref<1x32xf32, #tpu.memory_space<vmem>>, %arg9: memref<1x1xf32, #tpu.memory_space<vmem>>, %arg10: memref<1x384xf32, #tpu.memory_space<vmem>>) attributes {dimension_semantics = [#tpu.dimension_semantics<parallel>], iteration_bounds = array<i64: 1>, scalar_prefetch = 0 : i64, scratch_operands = 0 : i64, tpu.core_type = #tpu.core_type<tc>, window_params = [{transform_indices = @transform_0, window_bounds = array<i64: 2, 384>}, {pipeline_mode = #tpu.pipeline_mode<synchronous>, transform_indices = @transform_1, window_bounds = array<i64: 32, 2>}, {pipeline_mode = #tpu.pipeline_mode<synchronous>, transform_indices = @transform_2, window_bounds = array<i64: 32, 1>}, {pipeline_mode = #tpu.pipeline_mode<synchronous>, transform_indices = @transform_3, window_bounds = array<i64: 32, 32>}, {pipeline_mode = #tpu.pipeline_mode<synchronous>, transform_indices = @transform_4, window_bounds = array<i64: 32, 1>}, {pipeline_mode = #tpu.pipeline_mode<synchronous>, transform_indices = @transform_5, window_bounds = array<i64: 32, 32>}, {pipeline_mode = #tpu.pipeline_mode<synchronous>, transform_indices = @transform_6, window_bounds = array<i64: 32, 1>}, {pipeline_mode = #tpu.pipeline_mode<synchronous>, transform_indices = @transform_7, window_bounds = array<i64: 1, 32>}, {pipeline_mode = #tpu.pipeline_mode<synchronous>, transform_indices = @transform_8, window_bounds = array<i64: 1, 1>}, {transform_indices = @transform_9, window_bounds = array<i64: 1, 384>}]} {
    %c0 = arith.constant 0 : index
    %c0_0 = arith.constant 0 : index
    %0 = vector.load %arg1[%c0, %c0_0] : memref<2x384xf32, #tpu.memory_space<vmem>>, vector<2x384xf32>
    %c0_1 = arith.constant 0 : index
    %c0_2 = arith.constant 0 : index
    %1 = vector.load %arg2[%c0_1, %c0_2] : memref<32x2xf32, #tpu.memory_space<vmem>>, vector<32x2xf32>
    %2 = vector.extract_strided_slice %1 {offsets = [0, 0], sizes = [32, 1], strides = [1, 1]} : vector<32x2xf32> to vector<32x1xf32>
    %3 = vector.extract_strided_slice %0 {offsets = [0, 0], sizes = [1, 384], strides = [1, 1]} : vector<2x384xf32> to vector<1x384xf32>
    %4 = vector.broadcast %2 : vector<32x1xf32> to vector<32x384xf32>
    %5 = vector.broadcast %3 : vector<1x384xf32> to vector<32x384xf32>
    %6 = arith.mulf %4, %5 : vector<32x384xf32>
    %7 = vector.extract_strided_slice %1 {offsets = [0, 1], sizes = [32, 1], strides = [1, 1]} : vector<32x2xf32> to vector<32x1xf32>
    %8 = vector.extract_strided_slice %0 {offsets = [1, 0], sizes = [1, 384], strides = [1, 1]} : vector<2x384xf32> to vector<1x384xf32>
    %9 = vector.broadcast %7 : vector<32x1xf32> to vector<32x384xf32>
    %10 = vector.broadcast %8 : vector<1x384xf32> to vector<32x384xf32>
    %11 = arith.mulf %9, %10 : vector<32x384xf32>
    %12 = arith.addf %6, %11 : vector<32x384xf32>
    %c0_3 = arith.constant 0 : index
    %c0_4 = arith.constant 0 : index
    %13 = vector.load %arg3[%c0_3, %c0_4] : memref<32x1xf32, #tpu.memory_space<vmem>>, vector<32x1xf32>
    %14 = vector.broadcast %13 : vector<32x1xf32> to vector<32x384xf32>
    %15 = arith.addf %12, %14 : vector<32x384xf32>
    %16 = math.tanh %15 : vector<32x384xf32>
    %c0_5 = arith.constant 0 : index
    %c0_6 = arith.constant 0 : index
    %17 = vector.load %arg4[%c0_5, %c0_6] : memref<32x32xf32, #tpu.memory_space<vmem>>, vector<32x32xf32>
    %cst = arith.constant dense<0.000000e+00> : vector<32x384xf32>
    %18 = tpu.matmul %17, %16, %cst {dimension_numbers = #tpu.dot_dimension_numbers<[1], [0], [0], [1], [0, 0, 1, 1], [], []>} : vector<32x32xf32>, vector<32x384xf32>, vector<32x384xf32> -> vector<32x384xf32>
    %c0_7 = arith.constant 0 : index
    %c0_8 = arith.constant 0 : index
    %19 = vector.load %arg5[%c0_7, %c0_8] : memref<32x1xf32, #tpu.memory_space<vmem>>, vector<32x1xf32>
    %20 = vector.broadcast %19 : vector<32x1xf32> to vector<32x384xf32>
    %21 = arith.addf %18, %20 : vector<32x384xf32>
    %22 = math.tanh %21 : vector<32x384xf32>
    %c0_9 = arith.constant 0 : index
    %c0_10 = arith.constant 0 : index
    %23 = vector.load %arg6[%c0_9, %c0_10] : memref<32x32xf32, #tpu.memory_space<vmem>>, vector<32x32xf32>
    %cst_11 = arith.constant dense<0.000000e+00> : vector<32x384xf32>
    %24 = tpu.matmul %23, %22, %cst_11 {dimension_numbers = #tpu.dot_dimension_numbers<[1], [0], [0], [1], [0, 0, 1, 1], [], []>} : vector<32x32xf32>, vector<32x384xf32>, vector<32x384xf32> -> vector<32x384xf32>
    %c0_12 = arith.constant 0 : index
    %c0_13 = arith.constant 0 : index
    %25 = vector.load %arg7[%c0_12, %c0_13] : memref<32x1xf32, #tpu.memory_space<vmem>>, vector<32x1xf32>
    %26 = vector.broadcast %25 : vector<32x1xf32> to vector<32x384xf32>
    %27 = arith.addf %24, %26 : vector<32x384xf32>
    %28 = math.tanh %27 : vector<32x384xf32>
    %c0_14 = arith.constant 0 : index
    %c0_15 = arith.constant 0 : index
    %29 = vector.load %arg8[%c0_14, %c0_15] : memref<1x32xf32, #tpu.memory_space<vmem>>, vector<1x32xf32>
    %cst_16 = arith.constant dense<0.000000e+00> : vector<1x384xf32>
    %30 = tpu.matmul %29, %28, %cst_16 {dimension_numbers = #tpu.dot_dimension_numbers<[1], [0], [0], [1], [0, 0, 1, 1], [], []>} : vector<1x32xf32>, vector<32x384xf32>, vector<1x384xf32> -> vector<1x384xf32>
    %c0_17 = arith.constant 0 : index
    %c0_18 = arith.constant 0 : index
    %31 = vector.load %arg9[%c0_17, %c0_18] : memref<1x1xf32, #tpu.memory_space<vmem>>, vector<1x1xf32>
    %32 = vector.broadcast %31 : vector<1x1xf32> to vector<1x384xf32>
    %33 = arith.addf %30, %32 : vector<1x384xf32>
    %c0_19 = arith.constant 0 : index
    %c0_20 = arith.constant 0 : index
    %34 = vector.load %arg10[%c0_19, %c0_20] : memref<1x384xf32, #tpu.memory_space<vmem>>, vector<1x384xf32>
    tpu.vector_store %arg10[%c0_19, %c0_20], %33 {strides = array<i32>} : memref<1x384xf32, #tpu.memory_space<vmem>>, vector<1x384xf32>,
    return
  }
  func.func @transform_0(%arg0: i32) -> (i32, i32) {
    %c0_i32 = arith.constant 0 : i32
    %c0_i32_0 = arith.constant 0 : i32
    return %c0_i32, %arg0 : i32, i32
  }
  func.func @transform_1(%arg0: i32) -> (i32, i32) {
    %c0_i32 = arith.constant 0 : i32
    %c0_i32_0 = arith.constant 0 : i32
    %c0_i32_1 = arith.constant 0 : i32
    return %c0_i32, %c0_i32_0 : i32, i32
  }
  func.func @transform_2(%arg0: i32) -> (i32, i32) {
    %c0_i32 = arith.constant 0 : i32
    %c0_i32_0 = arith.constant 0 : i32
    %c0_i32_1 = arith.constant 0 : i32
    return %c0_i32, %c0_i32_0 : i32, i32
  }
  func.func @transform_3(%arg0: i32) -> (i32, i32) {
    %c0_i32 = arith.constant 0 : i32
    %c0_i32_0 = arith.constant 0 : i32
    %c0_i32_1 = arith.constant 0 : i32
    return %c0_i32, %c0_i32_0 : i32, i32
  }
  func.func @transform_4(%arg0: i32) -> (i32, i32) {
    %c0_i32 = arith.constant 0 : i32
    %c0_i32_0 = arith.constant 0 : i32
    %c0_i32_1 = arith.constant 0 : i32
    return %c0_i32, %c0_i32_0 : i32, i32
  }
  func.func @transform_5(%arg0: i32) -> (i32, i32) {
    %c0_i32 = arith.constant 0 : i32
    %c0_i32_0 = arith.constant 0 : i32
    %c0_i32_1 = arith.constant 0 : i32
    return %c0_i32, %c0_i32_0 : i32, i32
  }
  func.func @transform_6(%arg0: i32) -> (i32, i32) {
    %c0_i32 = arith.constant 0 : i32
    %c0_i32_0 = arith.constant 0 : i32
    %c0_i32_1 = arith.constant 0 : i32
    return %c0_i32, %c0_i32_0 : i32, i32
  }
  func.func @transform_7(%arg0: i32) -> (i32, i32) {
    %c0_i32 = arith.constant 0 : i32
    %c0_i32_0 = arith.constant 0 : i32
    %c0_i32_1 = arith.constant 0 : i32
    return %c0_i32, %c0_i32_0 : i32, i32
  }
  func.func @transform_8(%arg0: i32) -> (i32, i32) {
    %c0_i32 = arith.constant 0 : i32
    %c0_i32_0 = arith.constant 0 : i32
    %c0_i32_1 = arith.constant 0 : i32
    return %c0_i32, %c0_i32_0 : i32, i32
  }
  func.func @transform_9(%arg0: i32) -> (i32, i32) {
    %c0_i32 = arith.constant 0 : i32
    %c0_i32_0 = arith.constant 0 : i32
    return %c0_i32, %arg0 : i32, i32
  }
}

</mosaic_0001>

<bundles_post_ra>
// kernel: tpu_custom_call.1
= control target key start
LH: loop header
LB: loop body
LE: loop exit
PB: predicated region body
PF: predicated region fallthrough
CT: control target
= control target key end

     0   :  { %s1306_s0 = inlined_call_operand.vmem [shape: f32[2,384], index: 0, kind: input, shape index: {}]   ;;  %s1307_s1 = inlined_call_operand.vmem [shape: f32[32,2], index: 1, kind: input, shape index: {}]   ;;  %s1308_s2 = inlined_call_operand.vmem [shape: f32[32,1], index: 2, kind: input, shape index: {}]   ;;  %s1309_s3 = inlined_call_operand.vmem [shape: f32[32,32], index: 3, kind: input, shape index: {}]   ;;  %s1310_s4 = inlined_call_operand.vmem [shape: f32[32,1], index: 4, kind: input, shape index: {}]   ;;  %s1311_s5 = inlined_call_operand.vmem [shape: f32[32,32], index: 5, kind: input, shape index: {}]   ;;  %s1312_s6 = inlined_call_operand.vmem [shape: f32[32,1], index: 6, kind: input, shape index: {}]   ;;  %s1313_s7 = inlined_call_operand.vmem [shape: f32[1,32], index: 7, kind: input, shape index: {}]   ;;  %s1314_s8 = inlined_call_operand.<no memory space> [shape: f32[1,1], index: 8, kind: input, shape index: {}]   ;;  %s1315_s9 = inlined_call_operand.hbm [shape: f32[1,384], index: 9, kind: output, shape index: {}]  }
   0x1   :  { %v14_v0 = vstv %s1314_s8 }
   0x2   :  { %15 = vst [vmem:[#allocation2] sm:$0x1] %v14_v0 }
   0x3   :  { %v38_v1 = vld [vmem:[%s1307_s1 + $0x10] sm:$0xff]  ;;  %v36_v2 = vld [vmem:[%s1307_s1] sm:$0xff]  ;;  %v1102_v3 = vmov 1   ;;  %v37_v4 = vld [vmem:[%s1307_s1 + $0x8] sm:$0xff]  ;;  %v1103_v5 = vmov 0  }
   0x4   :  { %1002 = vset.pattern.permute.xlu0 %v1102_v3  ;;  %1000 = vset.pattern.permute.xlu1 %v1102_v3 }
   0x5   :  { %109 = vperm.xlu0 %1002, %v38_v1   ;;  %101 = vperm.xlu1 %1000, %v36_v2  }
   0x9   :  { %1003 = vset.pattern.permute.xlu0 %v1103_v5  ;;  %105 = vperm.xlu1 %1000, %v37_v4  }
   0xa   :  { %16 = vsyncpa [#allocation4], 0  ;;  %42 = vperm.xlu0 %1003, %v36_v2   ;;  %v39_v6 = vld [vmem:[%s1307_s1 + $0x18] sm:$0xff]  ;;  %v168_v7 = vld [vmem:[%s1308_s2 + $0x8] sm:$0xff]  ;;  %vm243_vm0 = vcmask 261120   ;;  %v1104_v21 = vmov 0.0   ;;  %v61_v22 = vlaneseq }
   0xb   :  { %v167_v8 = vld [vmem:[%s1308_s2] sm:$0xff]  ;;  %v169_v10 = vld [vmem:[%s1308_s2 + $0x10] sm:$0xff]  ;;  %v170_v12 = vld [vmem:[%s1308_s2 + $0x18] sm:$0xff]  ;;  %320 = vmatprep.mubr.f32.mxu0 %v1104_v21  ;;  %vm1106_vm1 = vmmov 0  }
   0xc   :  { %v219_v9 = vld [vmem:[%s1310_s4] sm:$0xff]  ;;  %v221_v11 = vld [vmem:[%s1310_s4 + $0x10] sm:$0xff]  ;;  %v220_v14 = vld [vmem:[%s1310_s4 + $0x8] sm:$0xff]  ;;  %v1219_v23 = vshrl.u32 %v61_v22, 7  ;;  %vm852_vm2 = vcmp.lt.s32.totalorder %v61_v22, 384 }
   0xd   :  { %1001 = vset.pattern.permute.xlu1 %v1103_v5  ;;  %v446_v13 = vld [vmem:[%s1312_s6] sm:$0xff]  ;;  %v448_v15 = vld [vmem:[%s1312_s6 + $0x10] sm:$0xff]  ;;  %v222_v16 = vld [vmem:[%s1310_s4 + $0x18] sm:$0xff] }
   0xe   :  { %47 = vperm.xlu0 %1003, %v37_v4   ;;  %57 = vperm.xlu1 %1001, %v39_v6   ;;  %v669_v17 = vld [vmem:[#allocation2] sm:$0x1]  ;;  %v447_v18 = vld [vmem:[%s1312_s6 + $0x8] sm:$0xff]  ;;  %v449_v19 = vld [vmem:[%s1312_s6 + $0x18] sm:$0xff]  ;;  %v1222_v26 = vsub.s32 0, %v1219_v23  ;;  %v67_v27 = vsub.s32 2, %v1219_v23 }
   0xf   :  { %v1213_v20 = vld [vmem:[%s1309_s3] sm:$0xff]  ;;  %v71_v28 = vsub.s32 4, %v1219_v23  ;;  %v118_v29 = vsub.s32 1, %v1219_v23  ;;  %v122_v30 = vsub.s32 3, %v1219_v23  ;;  %v126_v31 = vsub.s32 5, %v1219_v23 }
  0x10   :  { %916 = vmatprep.mubr.msk.f32.mxu1 %vm243_vm0, %v1213_v20  ;;  %v35_v32 = vld [vmem:[%s1306_s0] sm:$0x3f] }
  0x11   :  { %v64_v35 = vrot.slane %v35_v32, %v1222_v26  ;;  %v68_v36 = vrot.slane %v35_v32, %v67_v27  ;;  %v72_v37 = vrot.slane %v35_v32, %v71_v28  ;;  %v119_v38 = vrot.slane %v35_v32, %v118_v29 }
  0x12   :  { %52 = vperm.xlu0 %1003, %v38_v1   ;;  %1004 = vset.pattern.permute.xlu1 %v1102_v3  ;;  %v123_v39 = vrot.slane %v35_v32, %v122_v30  ;;  %v127_v40 = vrot.slane %v35_v32, %v126_v31 }
  0x13   :  { %113 = vperm.xlu1 %1004, %v39_v6   ;;  %v79_v41 = vrot.slane %v64_v35, %v1222_v26  ;;  %v83_v42 = vrot.slane %v68_v36, %v1222_v26  ;;  %v87_v45 = vrot.slane %v72_v37, %v1222_v26  ;;  %v134_v46 = vrot.slane %v119_v38, %v118_v29 }
  0x14   :  { %v138_v47 = vrot.slane %v123_v39, %v118_v29  ;;  %v142_v48 = vrot.slane %v127_v40, %v118_v29 }
  0x16   :  { %178 = vperm.xlu0 %1003, %v168_v7  }
  0x17   :  { %1005 = vset.pattern.permute.xlu1 %v1103_v5 }
  0x18   :  { %173 = vperm.xlu1 %1005, %v167_v8  }
  0x1a   :  { %225 = vperm.xlu0 %1003, %v219_v9  }
  0x1c   :  { %183 = vperm.xlu1 %1005, %v169_v10  }
  0x1e   :  { %235 = vperm.xlu0 %1003, %v221_v11  }
  0x20   :  { %188 = vperm.xlu1 %1005, %v170_v12  }
  0x22   :  { %452 = vperm.xlu0 %1003, %v446_v13  }
  0x24   :  { %230 = vperm.xlu1 %1005, %v220_v14  }
  0x26   :  { %462 = vperm.xlu0 %1003, %v448_v15  }
  0x28   :  { %240 = vperm.xlu1 %1005, %v222_v16  }
  0x2a   :  { %672 = vperm.xlu0 %1003, %v669_v17  }
  0x2c   :  { %457 = vperm.xlu1 %1005, %v447_v18  }
  0x30   :  { %467 = vperm.xlu1 %1005, %v449_v19  }
  0x84   :  { %v102_v24 = vpop.permute.xlu1 %101  ;;  %v110_v25 = vpop.permute.xlu0 %109 }
  0x85   :  { %v143_v59 = vmul.f32 %v134_v46, %v102_v24  ;;  %v144_v60 = vmul.f32 %v138_v47, %v102_v24  ;;  %v145_v1 = vmul.f32 %v142_v48, %v102_v24  ;;  %v149_v10 = vmul.f32 %v134_v46, %v110_v25 }
  0x86   :  { %v150_v11 = vmul.f32 %v138_v47, %v110_v25  ;;  %v151_v15 = vmul.f32 %v142_v48, %v110_v25 }
  0x88   :  { %v106_v33 = vpop.permute.xlu1 %105 }
  0x89   :  { %v43_v34 = vpop.permute.xlu0 %42  ;;  %v146_v55 = vmul.f32 %v134_v46, %v106_v33  ;;  %v147_v56 = vmul.f32 %v138_v47, %v106_v33  ;;  %v148_v57 = vmul.f32 %v142_v48, %v106_v33 }
  0x8a   :  { %v88_v52 = vmul.f32 %v79_v41, %v43_v34  ;;  %v89_v53 = vmul.f32 %v83_v42, %v43_v34  ;;  %v90_v61 = vmul.f32 %v87_v45, %v43_v34 }
  0x8c   :  { %v155_v4 = vadd.f32 %v143_v59, %v88_v52  ;;  %v156_v5 = vadd.f32 %v144_v60, %v89_v53  ;;  %v157_v14 = vadd.f32 %v145_v1, %v90_v61 }
  0x8d   :  { %v48_v43 = vpop.permute.xlu0 %47  ;;  %v58_v44 = vpop.permute.xlu1 %57 }
  0x8e   :  { %v91_v49 = vmul.f32 %v79_v41, %v48_v43  ;;  %v92_v50 = vmul.f32 %v83_v42, %v48_v43  ;;  %v93_v51 = vmul.f32 %v87_v45, %v48_v43  ;;  %v97_v30 = vmul.f32 %v79_v41, %v58_v44 }
  0x8f   :  { %v98_v31 = vmul.f32 %v83_v42, %v58_v44  ;;  %v99_v34 = vmul.f32 %v87_v45, %v58_v44 }
  0x90   :  { %v158_v62 = vadd.f32 %v146_v55, %v91_v49  ;;  %v159_v63 = vadd.f32 %v147_v56, %v92_v50  ;;  %v160_v0 = vadd.f32 %v148_v57, %v93_v51 }
  0x91   :  { %v53_v54 = vpop.permute.xlu0 %52 }
  0x92   :  { %v114_v58 = vpop.permute.xlu1 %113  ;;  %v94_v2 = vmul.f32 %v79_v41, %v53_v54  ;;  %v95_v6 = vmul.f32 %v83_v42, %v53_v54  ;;  %v96_v12 = vmul.f32 %v87_v45, %v53_v54 }
  0x93   :  { %v152_v18 = vmul.f32 %v134_v46, %v114_v58  ;;  %v153_v19 = vmul.f32 %v138_v47, %v114_v58  ;;  %v154_v27 = vmul.f32 %v142_v48, %v114_v58 }
  0x94   :  { %v161_v28 = vadd.f32 %v149_v10, %v94_v2  ;;  %v162_v29 = vadd.f32 %v150_v11, %v95_v6  ;;  %v163_v33 = vadd.f32 %v151_v15, %v96_v12 }
  0x95   :  { %v179_v3 = vpop.permute.xlu0 %178  ;;  %v164_v37 = vadd.f32 %v152_v18, %v97_v30  ;;  %v165_v38 = vadd.f32 %v153_v19, %v98_v31  ;;  %v166_v39 = vadd.f32 %v154_v27, %v99_v34 }
  0x96   :  { %v194_v7 = vadd.f32 %v179_v3, %v158_v62  ;;  %v195_v8 = vadd.f32 %v179_v3, %v159_v63  ;;  %v196_v9 = vadd.f32 %v179_v3, %v160_v0  ;;  %v216_v62 = vld [vmem:[%s1309_s3 + $0x8] sm:$0xff]  ;;  %v217_v63 = vld [vmem:[%s1309_s3 + $0x10] sm:$0xff]  ;;  %v218_v0 = vld [vmem:[%s1309_s3 + $0x18] sm:$0xff] }
  0x97   :  { %v174_v13 = vpop.permute.xlu1 %173 }
  0x98   :  { %1006 = vtanh.f32 %v194_v7  ;;  %v191_v16 = vadd.f32 %v174_v13, %v155_v4  ;;  %v192_v17 = vadd.f32 %v174_v13, %v156_v5  ;;  %v193_v24 = vadd.f32 %v174_v13, %v157_v14 }
  0x99   :  { %1008 = vtanh.f32 %v195_v8  ;;  %v226_v2 = vpop.permute.xlu0 %225 }
  0x9a   :  { %1010 = vtanh.f32 %v196_v9 }
  0x9b   :  { %1012 = vtanh.f32 %v191_v16  ;;  %v184_v32 = vpop.permute.xlu1 %183 }
  0x9c   :  { %1014 = vtanh.f32 %v192_v17  ;;  %v197_v35 = vadd.f32 %v184_v32, %v161_v28  ;;  %v198_v25 = vadd.f32 %v184_v32, %v162_v29  ;;  %v199_v36 = vadd.f32 %v184_v32, %v163_v33 }
  0x9d   :  { %1016 = vtanh.f32 %v193_v24  ;;  %v236_v16 = vpop.permute.xlu0 %235 }
  0x9e   :  { %1018 = vtanh.f32 %v197_v35 }
  0x9f   :  { %v189_v40 = vpop.permute.xlu1 %188  ;;  %1020 = vtanh.f32 %v198_v25 }
  0xa0   :  { %v200_v43 = vadd.f32 %v189_v40, %v164_v37  ;;  %v201_v46 = vadd.f32 %v189_v40, %v165_v38  ;;  %v202_v47 = vadd.f32 %v189_v40, %v166_v39  ;;  %1022 = vtanh.f32 %v199_v36 }
  0xa2   :  { %v1007_v41 = vpop.eup %1006  ;;  %1024 = vtanh.f32 %v200_v43 }
  0xa3   :  { %v1009_v42 = vpop.eup %1008  ;;  %1026 = vtanh.f32 %v201_v46  ;;  %v231_v1 = vpop.permute.xlu1 %230 }
  0xa4   :  { %v1011_v44 = vpop.eup %1010  ;;  %1028 = vtanh.f32 %v202_v47 }
  0xa5   :  { %v1013_v45 = vpop.eup %1012 }
  0xa6   :  { %v1015_v48 = vpop.eup %1014  ;;  %v949_v49 = vpack.c.bf16 %v1007_v41, %v1013_v45 }
  0xa7   :  { %v1017_v50 = vpop.eup %1016  ;;  %v947_v51 = vpack.c.bf16 %v1009_v42, %v1015_v48  ;;  %v241_v11 = vpop.permute.xlu1 %240  ;;  %v443_v48 = vld [vmem:[%s1311_s5 + $0x8] sm:$0xff] }
  0xa8   :  { %v955_v52 = vpack.c.bf16 %v1011_v44, %v1017_v50  ;;  %v1019_v53 = vpop.eup %1018  ;;  %v444_v50 = vld [vmem:[%s1311_s5 + $0x10] sm:$0xff] }
  0xa9   :  { %948 = vmatprep.subr.bf16.mxu0 %v947_v51  ;;  %v1021_v54 = vpop.eup %1020 }
  0xaa   :  { %956 = vmatprep.subr.bf16.mxu1 %v955_v52  ;;  %950 = vmatpush1.bf16.msra.mxu0 %v949_v49  ;;  %v1023_v55 = vpop.eup %1022 }
  0xab   :  { %958 = vmatpush3.bf16.msra.mxu1 %v955_v52 }
  0xac   :  { %v1025_v56 = vpop.eup %1024 }
  0xad   :  { %v1027_v57 = vpop.eup %1026  ;;  %v953_v58 = vpack.c.bf16 %v1025_v56, %v1019_v53  ;;  %v458_v56 = vpop.permute.xlu1 %457 }
  0xae   :  { %v1029_v59 = vpop.eup %1028  ;;  %v951_v60 = vpack.c.bf16 %v1027_v57, %v1021_v54  ;;  %v445_v54 = vld [vmem:[%s1311_s5 + $0x18] sm:$0xff]  ;;  %v453_v57 = vpop.permute.xlu0 %452 }
  0xaf   :  { %v959_v61 = vpack.c.bf16 %v1029_v59, %v1023_v55  ;;  %v1105_v55 = vmov 0.0|0.0  }
  0xb0   :  { %952 = vmatprep.subr.bf16.mxu0 %v951_v60 }
  0xb1   :  { %960 = vmatprep.subr.bf16.mxu1 %v959_v61  ;;  %954 = vmatpush1.bf16.msra.mxu0 %v953_v58 }
  0xb2   :  { %962 = vmatpush3.bf16.msra.mxu1 %v959_v61 }
  0xb4   :  { %869 = vmatmul.mubr.msk.f32.vlgmr.msra.gmra.mrb[0].mxu0 %vm243_vm0, %v1213_v20  ;;  %v1260_v20 = vld [vmem:[%s1311_s5] sm:$0xff] }
  0xb5   :  { %917 = vmatmul.mubr.msk.f32.vlgmr.msra.gmra.mrb[0].mxu1 %vm243_vm0, %v216_v62  ;;  %326 = vmatprep.mubr.f32.mxu0 %v1104_v21 }
  0xb6   :  { %919 = vmatprep.mubr.msk.f32.mxu1 %vm243_vm0, %v217_v63 }
  0xb8   :  { %870 = vmatmul.mubr.msk.f32.gmra.mrb[2].mxu0 %vm243_vm0, %v216_v62  ;;  %v468_v62 = vpop.permute.xlu1 %467 }
  0xb9   :  { %920 = vmatmul.mubr.msk.f32.gmra.mrb[2].mxu1 %vm243_vm0, %v218_v0  ;;  %332 = vmatprep.mubr.f32.mxu0 %v1104_v21 }
  0xba   :  { %546 = vmatprep.mubr.f32.mxu1 %v1104_v21 }
  0xbc   :  { %871 = vmatmul.mubr.msk.f32.gmra.mrb[4].mxu0 %vm243_vm0, %v217_v63 }
  0xbd   :  { %338 = vmatprep.mubr.f32.mxu0 %v1104_v21 }
  0xc0   :  { %872 = vmatmul.mubr.msk.f32.gmra.mrb[6].mxu0 %vm243_vm0, %v218_v0  ;;  %v463_v0 = vpop.permute.xlu0 %462 }
  0xc1   :  { %930 = vmatprep.mubr.msk.f32.mxu0 %vm243_vm0, %v1260_v20 }
 0x187   :  { %v322_v3 = vpop.f32.mrb[0].mxu0 }
 0x188   :  { %v323_v4 = vadd.f32 %v322_v3, %v226_v2  ;;  %v918_v5 = vpop.f32.mrb[0].mxu1  ;;  %v324_v6 = vpop.f32.mrb[1].mxu0 }
 0x189   :  { %v417_v7 = vadd.f32 %v918_v5, %v231_v1  ;;  %v325_v8 = vadd.f32 %v324_v6, %v226_v2  ;;  %v411_v9 = vpop.f32.mrb[1].mxu1 }
 0x18a   :  { %1030 = vtanh.f32 %v323_v4  ;;  %v412_v10 = vadd.f32 %v411_v9, %v226_v2 }
 0x18b   :  { %1032 = vtanh.f32 %v417_v7  ;;  %v328_v12 = vpop.f32.mrb[2].mxu0 }
 0x18c   :  { %1034 = vtanh.f32 %v325_v8  ;;  %v329_v13 = vadd.f32 %v328_v12, %v231_v1  ;;  %v921_v14 = vpop.f32.mrb[2].mxu1  ;;  %v330_v15 = vpop.f32.mrb[3].mxu0 }
 0x18d   :  { %1036 = vtanh.f32 %v412_v10  ;;  %v427_v17 = vadd.f32 %v921_v14, %v241_v11  ;;  %v331_v18 = vadd.f32 %v330_v15, %v231_v1  ;;  %v421_v19 = vpop.f32.mrb[3].mxu1 }
 0x18e   :  { %1038 = vtanh.f32 %v329_v13  ;;  %v422_v24 = vadd.f32 %v421_v19, %v236_v16 }
 0x18f   :  { %1040 = vtanh.f32 %v427_v17  ;;  %v334_v27 = vpop.f32.mrb[4].mxu0 }
 0x190   :  { %1042 = vtanh.f32 %v331_v18  ;;  %v335_v28 = vadd.f32 %v334_v27, %v236_v16  ;;  %v336_v29 = vpop.f32.mrb[5].mxu0 }
 0x191   :  { %1044 = vtanh.f32 %v422_v24  ;;  %v337_v30 = vadd.f32 %v336_v29, %v236_v16 }
 0x192   :  { %1046 = vtanh.f32 %v335_v28 }
 0x193   :  { %v340_v31 = vpop.f32.mrb[6].mxu0  ;;  %1048 = vtanh.f32 %v337_v30 }
 0x194   :  { %v1031_v32 = vpop.eup %1030  ;;  %v341_v33 = vadd.f32 %v340_v31, %v241_v11  ;;  %v342_v34 = vpop.f32.mrb[7].mxu0  ;;  %v668_v31 = vld [vmem:[%s1313_s7] sm:$0x1]  ;;  %s1108_s7 = smov [#allocation3]  }
 0x195   :  { %v1033_v35 = vpop.eup %1032  ;;  %v343_v25 = vadd.f32 %v342_v34, %v241_v11  ;;  %s861_s11 = sshll.u32 %s1108_s7, 4  ;;  %s862_s11 = int_to_ptr.vmem [resolvable:$true] %s861_s11 }
 0x196   :  { %v1035_v36 = vpop.eup %1034  ;;  %1050 = vtanh.f32 %v341_v33  ;;  %s1078_s12 = scalar_lea.vmem %s862_s11, 48  ;;  %s1082_s13 = scalar_lea.vmem %s862_s11, 64 }
 0x197   :  { %v1037_v37 = vpop.eup %1036  ;;  %1052 = vtanh.f32 %v343_v25  ;;  %p1079_p0 = scmp.ne.s32.totalorder %s862_s11, %s1078_s12  ;;  %p1083_p1 = scmp.lt.s32.totalorder %s862_s11, %s862_s11 }
 0x198   :  { %v1039_v38 = vpop.eup %1038  ;;  %v971_v39 = vpack.c.bf16 %v1033_v35, %v1037_v37  ;;  %p1084_p2 = scmp.lt.s32.totalorder %s1082_s13, %s1078_s12 }
 0x199   :  { %v1041_v40 = vpop.eup %1040  ;;  %v965_v43 = vpack.c.bf16 %v1039_v38, %v1031_v32 }
 0x19a   :  { %v1043_v46 = vpop.eup %1042  ;;  %972 = vmatprep.subr.bf16.mxu0 %v971_v39  ;;  %p1085_p3 = por %p1084_p2, %p1083_p1 }
 0x19b   :  { %v1045_v47 = vpop.eup %1044  ;;  %974 = vmatpush3.bf16.msra.mxu0 %v971_v39  ;;  %v963_v41 = vpack.c.bf16 %v1043_v46, %v1035_v36 }
 0x19c   :  { %v975_v42 = vpack.c.bf16 %v1041_v40, %v1045_v47  ;;  %v1047_v44 = vpop.eup %1046  ;;  %p1086_p4 = pnand %p1085_p3, %p1079_p0 }
 0x19d   :  { %964 = vmatprep.subr.bf16.mxu1 %v963_v41  ;;  %v1049_v45 = vpop.eup %1048  ;;  %v1107_v41 = vmov 1966171168  }
 0x19e   :  { %976 = vmatprep.subr.bf16.mxu0 %v975_v42  ;;  %966 = vmatpush1.bf16.msra.mxu1 %v965_v43 }
 0x19f   :  { %978 = vmatpush3.bf16.msra.mxu0 %v975_v42  ;;  %v828_v42 = vunpack.c.l.s4 %v1107_v41 }
 0x1a0   :  { %v1051_v49 = vpop.eup %1050 }
 0x1a1   :  { %v1053_v51 = vpop.eup %1052  ;;  %v969_v52 = vpack.c.bf16 %v1051_v49, %v1047_v44  ;;  %v673_v44 = vpop.permute.xlu0 %672 }
 0x1a2   :  { %931 = vmatmul.mubr.msk.f32.vlgmr.msra.gmra.mrb[8].mxu0 %vm243_vm0, %v443_v48  ;;  %v967_v53 = vpack.c.bf16 %v1053_v51, %v1049_v45  ;;  %v829_v45 = vunpack.c.0.s8 %v828_v42 }
 0x1a3   :  { %933 = vmatprep.mubr.msk.f32.mxu0 %vm243_vm0, %v444_v50 }
 0x1a4   :  { %968 = vmatprep.subr.bf16.mxu1 %v967_v53  ;;  %v832_v53 = vsub.s32 %v829_v45, %v1219_v23 }
 0x1a5   :  { %970 = vmatpush1.bf16.msra.mxu1 %v969_v52 }
 0x1a6   :  { %934 = vmatmul.mubr.msk.f32.gmra.mrb[10].mxu0 %vm243_vm0, %v445_v54  ;;  %987 = vmatprep.subr.bf16.mxu1 %v1105_v55 }
 0x1a7   :  { %746 = vmatprep.mubr.f32.mxu0 %v1104_v21 }
 0x1a8   :  { %877 = vmatmul.mubr.msk.f32.vlgmr.msra.gmra.mrb[4].mxu1 %vm243_vm0, %v1260_v20 }
 0x1a9   :  { %552 = vmatprep.mubr.f32.mxu1 %v1104_v21 }
 0x1ac   :  { %878 = vmatmul.mubr.msk.f32.gmra.mrb[6].mxu1 %vm243_vm0, %v443_v48  ;;  %v678_v48 = vrot.slane %v673_v44, %v1222_v26 }
 0x1ad   :  { %558 = vmatprep.mubr.f32.mxu1 %v1104_v21 }
 0x1b0   :  { %879 = vmatmul.mubr.msk.f32.gmra.mrb[8].mxu1 %vm243_vm0, %v444_v50 }
 0x1b1   :  { %564 = vmatprep.mubr.f32.mxu1 %v1104_v21 }
 0x1b4   :  { %880 = vmatmul.mubr.msk.f32.gmra.mrb[10].mxu1 %vm243_vm0, %v445_v54 }
 0x1b5   :  { %944 = vmatprep.mubr.msk.f32.mxu1 %vm1106_vm1, %v1104_v21 }
 0x275   :  { %v932_v58 = vpop.f32.mrb[8].mxu0 }
 0x276   :  { %v643_v59 = vadd.f32 %v932_v58, %v458_v56  ;;  %v637_v60 = vpop.f32.mrb[9].mxu0 }
 0x277   :  { %v638_v61 = vadd.f32 %v637_v60, %v453_v57 }
 0x278   :  { %1054 = vtanh.f32 %v643_v59 }
 0x279   :  { %1056 = vtanh.f32 %v638_v61  ;;  %v935_v63 = vpop.f32.mrb[10].mxu0 }
 0x27a   :  { %v653_v20 = vadd.f32 %v935_v63, %v468_v62  ;;  %v647_v1 = vpop.f32.mrb[11].mxu0 }
 0x27b   :  { %v648_v2 = vadd.f32 %v647_v1, %v463_v0  ;;  %v548_v3 = vpop.f32.mrb[4].mxu1 }
 0x27c   :  { %1058 = vtanh.f32 %v653_v20  ;;  %v549_v4 = vadd.f32 %v548_v3, %v453_v57  ;;  %v550_v5 = vpop.f32.mrb[5].mxu1 }
 0x27d   :  { %1060 = vtanh.f32 %v648_v2  ;;  %v551_v21 = vadd.f32 %v550_v5, %v453_v57 }
 0x27e   :  { %1062 = vtanh.f32 %v549_v4 }
 0x27f   :  { %v554_v6 = vpop.f32.mrb[6].mxu1  ;;  %1064 = vtanh.f32 %v551_v21 }
 0x280   :  { %v555_v7 = vadd.f32 %v554_v6, %v458_v56  ;;  %v556_v8 = vpop.f32.mrb[7].mxu1 }
 0x281   :  { %v557_v9 = vadd.f32 %v556_v8, %v458_v56 }
 0x282   :  { %v1055_v10 = vpop.eup %1054  ;;  %1066 = vtanh.f32 %v555_v7 }
 0x283   :  { %v1057_v11 = vpop.eup %1056  ;;  %1068 = vtanh.f32 %v557_v9  ;;  %v560_v12 = vpop.f32.mrb[8].mxu1 }
 0x284   :  { %v561_v13 = vadd.f32 %v560_v12, %v463_v0  ;;  %v562_v14 = vpop.f32.mrb[9].mxu1  ;;  %v988_v15 = vpack.c.bf16 %v1055_v10, %v1057_v11 }
 0x285   :  { %v563_v16 = vadd.f32 %v562_v14, %v463_v0 }
 0x286   :  { %v1059_v17 = vpop.eup %1058  ;;  %989 = vmatpush3.bf16.msra.mxu1 %v988_v15  ;;  %1070 = vtanh.f32 %v561_v13 }
 0x287   :  { %v1061_v18 = vpop.eup %1060  ;;  %v566_v19 = vpop.f32.mrb[10].mxu1  ;;  %990 = vmatprep.subr.bf16.mxu1 %v1105_v55  ;;  %1072 = vtanh.f32 %v563_v16 }
 0x288   :  { %v567_v24 = vadd.f32 %v566_v19, %v468_v62  ;;  %v568_v27 = vpop.f32.mrb[11].mxu1  ;;  %v991_v28 = vpack.c.bf16 %v1059_v17, %v1061_v18  ;;  %v1063_v30 = vpop.eup %1062 }
 0x289   :  { %v569_v29 = vadd.f32 %v568_v27, %v468_v62  ;;  %v1065_v32 = vpop.eup %1064 }
 0x28a   :  { %1074 = vtanh.f32 %v567_v24  ;;  %992 = vmatpush3.bf16.msra.mxu1 %v991_v28 }
 0x28b   :  { %1076 = vtanh.f32 %v569_v29 }
 0x28c   :  { %v1067_v33 = vpop.eup %1066 }
 0x28d   :  { %v1069_v34 = vpop.eup %1068  ;;  %945 = vmatmul.mubr.msk.f32.vlgmr.msra.gmra.mrb[12].mxu1 %vm243_vm0, %v668_v31  ;;  %v981_v35 = vpack.c.bf16 %v1067_v33, %v1063_v30 }
 0x28e   :  { %v979_v25 = vpack.c.bf16 %v1069_v34, %v1065_v32 }
 0x290   :  { %980 = vmatprep.subr.bf16.mxu0 %v979_v25  ;;  %v1071_v36 = vpop.eup %1070 }
 0x291   :  { %982 = vmatpush1.bf16.msra.mxu0 %v981_v35  ;;  %v1073_v37 = vpop.eup %1072 }
 0x294   :  { %v1075_v38 = vpop.eup %1074 }
 0x295   :  { %v1077_v39 = vpop.eup %1076  ;;  %v985_v40 = vpack.c.bf16 %v1075_v38, %v1071_v36 }
 0x296   :  { %v983_v43 = vpack.c.bf16 %v1077_v39, %v1073_v37 }
 0x298   :  { %984 = vmatprep.subr.bf16.mxu0 %v983_v43 }
 0x299   :  { %986 = vmatpush1.bf16.msra.mxu0 %v985_v40 }
 0x29c   :  { %885 = vmatmul.mubr.msk.f32.vlgmr.msra.gmra.mrb[12].mxu0 %vm243_vm0, %v668_v31 }
 0x360   :  { %v819_v46 = vpop.f32.mrb[12].mxu1 }
 0x361   :  { %v946_v47 = vpop.f32.mrb[13].mxu1  ;;  %v820_v52 = vadd.f32 %v819_v46, %v678_v48 }
 0x363   :  { %v840_v56 = vrot.slane %v820_v52, %v832_v53 }
 0x36f   :  { %v748_v49 = vpop.f32.mrb[12].mxu0 }
 0x370   :  { %v749_v50 = vadd.f32 %v748_v49, %v678_v48  ;;  %v750_v51 = vpop.f32.mrb[13].mxu0 }
 0x371   :  { %v751_v54 = vadd.f32 %v750_v51, %v678_v48 }
 0x373   :  { %v826_v55 = vcombine.low %v749_v50, %v751_v54 }
 0x375   :  { %v833_v57 = vrot.slane %v826_v55, %v832_v53 }
 0x377   :  { %v841_v58 = vcombine.low %v833_v57, %v840_v56 }
 0x379   :  { %v848_v59 = vrot.slane %v841_v58, %v832_v53 }
 0x37b   :  { %854 = vst.msk [vmem:[#allocation3] sm:$0x7] %vm852_vm2, %v848_v59 }
 0x37c   :  { %1089 = shalt.err (!%p1086_p4)
}
 0x37d   :  { %s1090_s2 = scalar_lea.hbm %s1315_s9, 48 }
 0x37e   :  { %p1091_p5 = scmp.ne.s32.totalorder %s1315_s9, %s1090_s2  ;;  %p1094_p6 = scmp.lt.u32.totalorder %s1090_s2, %s1315_s9 }
 0x380   :  { %p1096_p7 = pnand %p1094_p6, %p1091_p5 }
 0x382   :  { %1099 = shalt.err (!%p1096_p7)
}
 0x383   :  { %864 = dma.vmem_to_hbm [thread:$0]  %s862_s11, 48, %s1315_s9, [#allocation4]  }
 0x384   :  { %1100 = dma.done.wait [#allocation4], 48  }
 0x385   :  { %1101 = vsyncadd [#allocation4], 4294967248 }
 0x386   :  { %868 = vsyncpa [#allocation4], 1 }

</bundles_post_ra>
